<compile_context>
chip_gen: v7x
topology: tpu7x:2x2x1
jax: 0.10.0
libtpu: 0.0.40
codegen_flags: <defaults>
</compile_context>

<pallas_src>
import functools

import jax
import jax.numpy as jnp
from jax.experimental import pallas as pl
from jax.experimental.pallas import tpu as pltpu

_LANE = 128


def _round_up(x: int, m: int) -> int:
    return ((x + m - 1) // m) * m


def _sublane_multiple(dtype) -> int:
    # Minimum second-to-last tile dim per element width (f32:8, bf16:16, i8:32).
    return {4: 8, 2: 16, 1: 32}.get(jnp.dtype(dtype).itemsize, 8)


def _tpu_params():
    """Best-effort chip query -> (tensorcores_per_device, vmem_capacity_bytes,
    packed_bf16_ok).  Conservative fallbacks: 2 TCs (harmless 2-iteration
    outer loop on 1-TC chips), 64 MiB VMEM (v7x minimum), f32-only compute."""
    num_tc, vmem_cap, bf16_ok = 2, 64 << 20, False
    try:
        kind = jax.devices()[0].device_kind.lower()
        one_tc = any(t in kind for t in ("v2", "v3", "v5 lite", "v5e", "v6"))
        num_tc = 1 if one_tc else 2
        bf16_ok = not any(t in kind for t in ("v2", "v3", "v4", "v5"))
    except Exception:
        pass
    try:
        vmem_cap = int(pltpu.get_tpu_info().vmem_capacity_bytes)
    except Exception:
        pass
    return num_tc, vmem_cap, bf16_ok


def _dice_partial_kernel(pred_ref, true_ref, out_ref, acc_ref, *,
                         rows, tile_rows, steps_total, steps_per_split,
                         needs_mask, compute_dtype):
    c = pl.program_id(0)   # split axis ("parallel": one half per TC on v7x)
    i = pl.program_id(1)   # reduction axis ("arbitrary")

    @pl.when(i == 0)
    def _():
        acc_ref[...] = jnp.zeros_like(acc_ref)

    # sigmoid(x) = 0.5 * tanh(0.5 x) + 0.5 keeps the transcendental on the EUP
    # slot (no VALU Newton-Raphson divide).  On v6e/v7x with bf16 logits the
    # EUP/VPU work runs packed bf16; accumulation is always f32.
    half = jnp.asarray(0.5, compute_dtype)
    x = pred_ref[...].astype(compute_dtype)
    p = (half * jnp.tanh(half * x) + half).astype(jnp.float32)
    t = true_ref[...].astype(jnp.float32)
    inter = p * t
    card = p + t

    folds = tile_rows // 8

    def accumulate(inter_v, card_v):
        # Vreg-aligned fold into the (8, 128) f32 accumulator: pure VPU adds,
        # no per-step cross-lane reduce.
        acc_ref[0] += inter_v.reshape(folds, 8, _LANE).sum(axis=0)
        acc_ref[1] += card_v.reshape(folds, 8, _LANE).sum(axis=0)

    if needs_mask:
        blk = c * steps_per_split + i
        is_full = blk < steps_total - 1   # tail = partial last block / clamped redundant block

        @pl.when(is_full)
        def _():
            accumulate(inter, card)       # hot path: no iota/compare/select

        @pl.when(jnp.logical_not(is_full))
        def _():
            row_idx = blk * tile_rows + jax.lax.broadcasted_iota(
                jnp.int32, (tile_rows, _LANE), 0)
            valid = row_idx < rows
            accumulate(jnp.where(valid, inter, 0.0),
                       jnp.where(valid, card, 0.0))
    else:
        accumulate(inter, card)

    @pl.when(i == pl.num_programs(1) - 1)
    def _():
        # Single cross-lane/cross-sublane reduction per split.
        out_ref[0, 0] = jnp.sum(acc_ref[0])   # intersection partial
        out_ref[0, 1] = jnp.sum(acc_ref[1])   # cardinality partial


def dice_loss(y_pred_logits, y_true, smooth: float = 1e-5, tile_rows=None):
    pred = y_pred_logits.reshape(-1)
    true = y_true.reshape(-1)
    if true.dtype == jnp.bool_:
        true = true.astype(jnp.int8)          # 1 B/elem label stream

    n = pred.shape[0]
    rows = n // _LANE
    rem = n - rows * _LANE

    # Lane-unaligned tail (< 128 elems): reduce it with plain jnp ops instead
    # of padding (and re-writing) the whole arrays in HBM.
    tail_inter = jnp.float32(0.0)
    tail_card = jnp.float32(0.0)
    smooth32 = jnp.float32(smooth)
    if rem:
        p_tail = jax.nn.sigmoid(pred[rows * _LANE:].astype(jnp.float32))
        t_tail = true[rows * _LANE:].astype(jnp.float32)
        tail_inter = jnp.sum(p_tail * t_tail)
        tail_card = jnp.sum(p_tail + t_tail)
        pred = pred[: rows * _LANE]
        true = true[: rows * _LANE]

    if rows == 0:
        return 1.0 - (2.0 * tail_inter + smooth32) / (tail_card + smooth32)

    num_tc, vmem_cap, bf16_ok = _tpu_params()
    vmem_budget = max(int(0.7 * vmem_cap), 16 << 20)
    compute_dtype = (jnp.bfloat16 if (bf16_ok and pred.dtype == jnp.bfloat16)
                     else jnp.float32)

    # Tile sizing: ~8 MiB of combined input per step so the per-step fixed
    # overhead (~0.35 us) is <10% of DMA time even at v7x bandwidth, clamped
    # so double-buffered inputs plus ~6 tile-sized f32 temporaries fit VMEM.
    sub = max(_sublane_multiple(pred.dtype), _sublane_multiple(true.dtype))
    itemsizes = pred.dtype.itemsize + true.dtype.itemsize
    bytes_per_row = _LANE * itemsizes
    if tile_rows is None:
        tile_rows = (8 << 20) // bytes_per_row
    fit_rows = vmem_budget // (_LANE * (2 * itemsizes + 24))
    tile_rows = min(int(tile_rows), fit_rows)
    tile_rows = max(sub, (tile_rows // sub) * sub)
    tile_rows = min(tile_rows, _round_up(rows, sub))

    steps_total = pl.cdiv(rows, tile_rows)
    num_splits = num_tc if steps_total >= num_tc else 1
    steps_per_split = pl.cdiv(steps_total, num_splits)
    needs_mask = (num_splits * steps_per_split * tile_rows) != rows

    pred2 = pred.reshape(rows, _LANE)
    true2 = true.reshape(rows, _LANE)

    def in_map(c, i):
        # Clamp so a redundant tail block (odd steps_total) re-reads a valid
        # block; its contribution is masked to zero in the kernel.
        blk = c * steps_per_split + i
        return (jnp.minimum(blk, steps_total - 1), 0)

    partials = pl.pallas_call(
        functools.partial(
            _dice_partial_kernel,
            rows=rows, tile_rows=tile_rows, steps_total=steps_total,
            steps_per_split=steps_per_split, needs_mask=needs_mask,
            compute_dtype=compute_dtype),
        out_shape=jax.ShapeDtypeStruct((num_splits, 2), jnp.float32),
        grid_spec=pltpu.PrefetchScalarGridSpec(
            num_scalar_prefetch=0,
            grid=(num_splits, steps_per_split),
            in_specs=[
                pl.BlockSpec((tile_rows, _LANE), in_map),
                pl.BlockSpec((tile_rows, _LANE), in_map),
            ],
            out_specs=pl.BlockSpec((1, 2), lambda c, i: (c, 0),
                                   memory_space=pltpu.SMEM),
            scratch_shapes=[pltpu.VMEM((2, 8, _LANE), jnp.float32)],
        ),
        compiler_params=pltpu.CompilerParams(
            dimension_semantics=("parallel", "arbitrary"),
            vmem_limit_bytes=int(vmem_budget),
        ),
    )(pred2, true2)

    inter = jnp.sum(partials[:, 0]) + tail_inter
    card = jnp.sum(partials[:, 1]) + tail_card
    return 1.0 - (2.0 * inter + smooth32) / (card + smooth32)


def _dice_loss_ref(y_pred_logits, y_true, smooth: float = 1e-5):
    p = jax.nn.sigmoid(y_pred_logits.astype(jnp.float32)).reshape(-1)
    t = y_true.astype(jnp.float32).reshape(-1)
    inter = jnp.sum(p * t)
    card = jnp.sum(p + t)
    return 1.0 - (2.0 * inter + smooth) / (card + smooth)


if __name__ == "__main__":
    key = jax.random.PRNGKey(0)
    k1, k2 = jax.random.split(key)
    # NCHW, like the PyTorch module would receive from a UNet head.
    x = jax.random.normal(k1, (2, 4, 16, 16), dtype=jnp.float32)
    y = (jax.random.uniform(k2, (2, 4, 16, 16)) > 0.5).astype(jnp.float32)

    loss = jax.block_until_ready(dice_loss(x, y))
    ref = jax.block_until_ready(_dice_loss_ref(x, y))

    assert jnp.allclose(loss, ref, atol=1e-5, rtol=1e-5), (loss, ref)
    print("KERNEL_OK")
</pallas_src>

<mosaic_0001>
module attributes {stable_mosaic.version = 11 : i64} {
  func.func @_dice_partial_kernel(%arg0: i32, %arg1: i32, %arg2: memref<16x128xf32, #tpu.memory_space<vmem>>, %arg3: memref<16x128xf32, #tpu.memory_space<vmem>>, %arg4: memref<1x2xf32, #tpu.memory_space<smem>>, %arg5: memref<2x8x128xf32, #tpu.memory_space<vmem>>) attributes {dimension_semantics = [#tpu.dimension_semantics<parallel>, #tpu.dimension_semantics<arbitrary>], iteration_bounds = array<i64: 1, 1>, scalar_prefetch = 0 : i64, scratch_operands = 1 : i64, tpu.core_type = #tpu.core_type<tc>, window_params = [{transform_indices = @transform_0, window_bounds = array<i64: 16, 128>}, {transform_indices = @transform_1, window_bounds = array<i64: 16, 128>}, {transform_indices = @transform_2, window_bounds = array<i64: 1, 2>}]} {
    %c0_i32 = arith.constant 0 : i32
    %0 = arith.cmpi eq, %arg1, %c0_i32 : i32
    %1 = arith.extui %0 : i1 to i32
    %c0_i32_0 = arith.constant 0 : i32
    %2 = arith.cmpi ne, %1, %c0_i32_0 : i32
    scf.if %2 {
      %cst_21 = arith.constant 0.000000e+00 : f32
      %33 = vector.broadcast %cst_21 : f32 to vector<2x8x128xf32>
      %c0_22 = arith.constant 0 : index
      %c0_23 = arith.constant 0 : index
      %c0_24 = arith.constant 0 : index
      %34 = vector.load %arg5[%c0_22, %c0_23, %c0_24] : memref<2x8x128xf32, #tpu.memory_space<vmem>>, vector<2x8x128xf32>
      tpu.vector_store %arg5[%c0_22, %c0_23, %c0_24], %33 {strides = array<i32>} : memref<2x8x128xf32, #tpu.memory_space<vmem>>, vector<2x8x128xf32>,
    } else {
    }
    %c0 = arith.constant 0 : index
    %c0_1 = arith.constant 0 : index
    %3 = vector.load %arg2[%c0, %c0_1] : memref<16x128xf32, #tpu.memory_space<vmem>>, vector<16x128xf32>
    %cst = arith.constant 5.000000e-01 : f32
    %4 = vector.broadcast %cst : f32 to vector<16x128xf32>
    %5 = arith.mulf %4, %3 : vector<16x128xf32>
    %6 = math.tanh %5 : vector<16x128xf32>
    %cst_2 = arith.constant 5.000000e-01 : f32
    %7 = vector.broadcast %cst_2 : f32 to vector<16x128xf32>
    %8 = arith.mulf %7, %6 : vector<16x128xf32>
    %cst_3 = arith.constant 5.000000e-01 : f32
    %9 = vector.broadcast %cst_3 : f32 to vector<16x128xf32>
    %10 = arith.addf %8, %9 : vector<16x128xf32>
    %c0_4 = arith.constant 0 : index
    %c0_5 = arith.constant 0 : index
    %11 = vector.load %arg3[%c0_4, %c0_5] : memref<16x128xf32, #tpu.memory_space<vmem>>, vector<16x128xf32>
    %12 = arith.mulf %10, %11 : vector<16x128xf32>
    %13 = arith.addf %10, %11 : vector<16x128xf32>
    %c0_6 = arith.constant 0 : index
    %c0_7 = arith.constant 0 : index
    %c0_8 = arith.constant 0 : index
    %14 = vector.load %arg5[%c0_6, %c0_7, %c0_8] : memref<2x8x128xf32, #tpu.memory_space<vmem>>, vector<1x8x128xf32>
    %15 = vector.shape_cast %14 : vector<1x8x128xf32> to vector<8x128xf32>
    %16 = vector.shape_cast %12 : vector<16x128xf32> to vector<2x8x128xf32>
    %cst_9 = arith.constant dense<0.000000e+00> : vector<8x128xf32>
    %17 = vector.multi_reduction <add>, %16, %cst_9 [0] : vector<2x8x128xf32> to vector<8x128xf32>
    %18 = arith.addf %15, %17 : vector<8x128xf32>
    %c0_10 = arith.constant 0 : index
    %c0_11 = arith.constant 0 : index
    %c0_12 = arith.constant 0 : index
    %19 = vector.load %arg5[%c0_10, %c0_11, %c0_12] : memref<2x8x128xf32, #tpu.memory_space<vmem>>, vector<1x8x128xf32>
    %20 = vector.shape_cast %19 : vector<1x8x128xf32> to vector<8x128xf32>
    %21 = vector.shape_cast %18 : vector<8x128xf32> to vector<1x8x128xf32>
    tpu.vector_store %arg5[%c0_10, %c0_11, %c0_12], %21 {strides = array<i32>} : memref<2x8x128xf32, #tpu.memory_space<vmem>>, vector<1x8x128xf32>,
    %c1 = arith.constant 1 : index
    %c0_13 = arith.constant 0 : index
    %c0_14 = arith.constant 0 : index
    %22 = vector.load %arg5[%c1, %c0_13, %c0_14] : memref<2x8x128xf32, #tpu.memory_space<vmem>>, vector<1x8x128xf32>
    %23 = vector.shape_cast %22 : vector<1x8x128xf32> to vector<8x128xf32>
    %24 = vector.shape_cast %13 : vector<16x128xf32> to vector<2x8x128xf32>
    %cst_15 = arith.constant dense<0.000000e+00> : vector<8x128xf32>
    %25 = vector.multi_reduction <add>, %24, %cst_15 [0] : vector<2x8x128xf32> to vector<8x128xf32>
    %26 = arith.addf %23, %25 : vector<8x128xf32>
    %c1_16 = arith.constant 1 : index
    %c0_17 = arith.constant 0 : index
    %c0_18 = arith.constant 0 : index
    %27 = vector.load %arg5[%c1_16, %c0_17, %c0_18] : memref<2x8x128xf32, #tpu.memory_space<vmem>>, vector<1x8x128xf32>
    %28 = vector.shape_cast %27 : vector<1x8x128xf32> to vector<8x128xf32>
    %29 = vector.shape_cast %26 : vector<8x128xf32> to vector<1x8x128xf32>
    tpu.vector_store %arg5[%c1_16, %c0_17, %c0_18], %29 {strides = array<i32>} : memref<2x8x128xf32, #tpu.memory_space<vmem>>, vector<1x8x128xf32>,
    %c0_i32_19 = arith.constant 0 : i32
    %30 = arith.cmpi eq, %arg1, %c0_i32_19 : i32
    %31 = arith.extui %30 : i1 to i32
    %c0_i32_20 = arith.constant 0 : i32
    %32 = arith.cmpi ne, %31, %c0_i32_20 : i32
    scf.if %32 {
      %c0_21 = arith.constant 0 : index
      %c0_22 = arith.constant 0 : index
      %c0_23 = arith.constant 0 : index
      %33 = vector.load %arg5[%c0_21, %c0_22, %c0_23] : memref<2x8x128xf32, #tpu.memory_space<vmem>>, vector<1x8x128xf32>
      %34 = vector.shape_cast %33 : vector<1x8x128xf32> to vector<8x128xf32>
      %35 = vector.shape_cast %34 : vector<8x128xf32> to vector<1x8x128xf32>
      %cst_24 = arith.constant dense<0.000000e+00> : vector<1xf32>
      %36 = vector.multi_reduction <add>, %35, %cst_24 [1, 2] : vector<1x8x128xf32> to vector<1xf32>
      %37 = vector.shape_cast %36 : vector<1xf32> to vector<1x1x1xf32>
      %38 = vector.extract %37[0, 0, 0] : f32 from vector<1x1x1xf32>
      %c0_25 = arith.constant 0 : index
      %c0_26 = arith.constant 0 : index
      %39 = memref.load %arg4[%c0_25, %c0_26] : memref<1x2xf32, #tpu.memory_space<smem>>
      memref.store %38, %arg4[%c0_25, %c0_26] : memref<1x2xf32, #tpu.memory_space<smem>>
      %c1_27 = arith.constant 1 : index
      %c0_28 = arith.constant 0 : index
      %c0_29 = arith.constant 0 : index
      %40 = vector.load %arg5[%c1_27, %c0_28, %c0_29] : memref<2x8x128xf32, #tpu.memory_space<vmem>>, vector<1x8x128xf32>
      %41 = vector.shape_cast %40 : vector<1x8x128xf32> to vector<8x128xf32>
      %42 = vector.shape_cast %41 : vector<8x128xf32> to vector<1x8x128xf32>
      %cst_30 = arith.constant dense<0.000000e+00> : vector<1xf32>
      %43 = vector.multi_reduction <add>, %42, %cst_30 [1, 2] : vector<1x8x128xf32> to vector<1xf32>
      %44 = vector.shape_cast %43 : vector<1xf32> to vector<1x1x1xf32>
      %45 = vector.extract %44[0, 0, 0] : f32 from vector<1x1x1xf32>
      %c0_31 = arith.constant 0 : index
      %c1_32 = arith.constant 1 : index
      %46 = memref.load %arg4[%c0_31, %c1_32] : memref<1x2xf32, #tpu.memory_space<smem>>
      memref.store %45, %arg4[%c0_31, %c1_32] : memref<1x2xf32, #tpu.memory_space<smem>>
    } else {
    }
    return
  }
  func.func @transform_0(%arg0: i32, %arg1: i32) -> (i32, i32) {
    %c1_i32 = arith.constant 1 : i32
    %0 = arith.muli %arg0, %c1_i32 : i32
    %1 = arith.addi %0, %arg1 : i32
    %c0_i32 = arith.constant 0 : i32
    %2 = arith.minsi %1, %c0_i32 : i32
    %c0_i32_0 = arith.constant 0 : i32
    %c0_i32_1 = arith.constant 0 : i32
    return %2, %c0_i32_0 : i32, i32
  }
  func.func @transform_1(%arg0: i32, %arg1: i32) -> (i32, i32) {
    %c1_i32 = arith.constant 1 : i32
    %0 = arith.muli %arg0, %c1_i32 : i32
    %1 = arith.addi %0, %arg1 : i32
    %c0_i32 = arith.constant 0 : i32
    %2 = arith.minsi %1, %c0_i32 : i32
    %c0_i32_0 = arith.constant 0 : i32
    %c0_i32_1 = arith.constant 0 : i32
    return %2, %c0_i32_0 : i32, i32
  }
  func.func @transform_2(%arg0: i32, %arg1: i32) -> (i32, i32) {
    %c0_i32 = arith.constant 0 : i32
    %c0_i32_0 = arith.constant 0 : i32
    return %arg0, %c0_i32 : i32, i32
  }
}

</mosaic_0001>

<bundles_post_ra>
// kernel: tpu_custom_call.1
= control target key start
LH: loop header
LB: loop body
LE: loop exit
PB: predicated region body
PF: predicated region fallthrough
CT: control target
= control target key end

     0   :  { %7 = vsyncpa [#allocation4], 0  ;;  %s266_s0 = inlined_call_operand.hbm [shape: f32[16,128], index: 0, kind: input, shape index: {}]   ;;  %s267_s1 = inlined_call_operand.hbm [shape: f32[16,128], index: 1, kind: input, shape index: {}]   ;;  %s268_s2 = inlined_call_operand.hbm [shape: f32[1,2], index: 2, kind: output, shape index: {}]  }
   0x1   :  { %8 = vsyncpa [#allocation7], 0 }
   0x2   :  { %9 = vsyncpa [#allocation5], 0  ;;  %s210_s9 = smov [#allocation3]   ;;  %s150_s13 = scalar_lea.hbm %s266_s0, 256 }
   0x3   :  { %s21_s10 = sshll.u32 %s210_s9, 4  ;;  %p151_p0 = scmp.ne.s32.totalorder %s266_s0, %s150_s13  ;;  %s22_s10 = int_to_ptr.vmem [resolvable:$true] %s21_s10 }
   0x4   :  { %p154_p1 = scmp.lt.u32.totalorder %s150_s13, %s266_s0 }
   0x6   :  { %p156_p2 = pnand %p154_p1, %p151_p0 }
   0x8   :  { %159 = shalt.err (!%p156_p2)
}
   0x9   :  { %s160_s18 = scalar_lea.vmem %s22_s10, 256  ;;  %p165_p4 = scmp.lt.s32.totalorder %s22_s10, %s22_s10 }
   0xa   :  { %p161_p3 = scmp.ne.s32.totalorder %s22_s10, %s160_s18  ;;  %p166_p5 = scmp.lt.s32.totalorder %s160_s18, %s160_s18 }
   0xc   :  { %p167_p6 = por %p166_p5, %p165_p4 }
   0xe   :  { %p168_p7 = pnand %p167_p6, %p161_p3 }
  0x10   :  { %171 = shalt.err (!%p168_p7)
}
  0x11   :  { %s211_s19 = smov 128   ;;  %s212_s20 = smov 8  }
  0x12   :  { %27 = dma.hbm_to_vmem [thread:$0]  %s266_s0, 256, %s22_s10, [#allocation4], %s211_s19, %s211_s19, %s212_s20  }
  0x13   :  { %s213_s23 = smov [#allocation6]   ;;  %s172_s27 = scalar_lea.hbm %s267_s1, 256 }
  0x14   :  { %s39_s24 = sshll.u32 %s213_s23, 4  ;;  %p173_p8 = scmp.ne.s32.totalorder %s267_s1, %s172_s27  ;;  %s40_s24 = int_to_ptr.vmem [resolvable:$true] %s39_s24 }
  0x15   :  { %p176_p9 = scmp.lt.u32.totalorder %s172_s27, %s267_s1 }
  0x17   :  { %p178_p10 = pnand %p176_p9, %p173_p8 }
  0x19   :  { %181 = shalt.err (!%p178_p10)
}
  0x1a   :  { %s182_s4 = scalar_lea.vmem %s40_s24, 256  ;;  %p187_p12 = scmp.lt.s32.totalorder %s40_s24, %s40_s24 }
  0x1b   :  { %p183_p11 = scmp.ne.s32.totalorder %s40_s24, %s182_s4  ;;  %p188_p13 = scmp.lt.s32.totalorder %s182_s4, %s182_s4 }
  0x1d   :  { %p189_p0 = por %p188_p13, %p187_p12 }
  0x1f   :  { %p190_p1 = pnand %p189_p0, %p183_p11 }
  0x21   :  { %193 = shalt.err (!%p190_p1)
}
  0x22   :  { %45 = dma.hbm_to_vmem [thread:$0]  %s267_s1, 256, %s40_s24, [#allocation7], %s211_s19, %s211_s19, %s212_s20  }
  0x23   :  { %204 = dma.done.wait [#allocation4], 256  }
  0x24   :  { %205 = vsyncadd [#allocation4], 4294967040 }
  0x25   :  { %206 = dma.done.wait [#allocation7], 256  }
  0x26   :  { %207 = vsyncadd [#allocation7], 4294967040  ;;  %v66_v0 = vld [vmem:[#allocation3] sm:$0xff]  ;;  %v67_v1 = vld [vmem:[#allocation3 + $0x8] sm:$0xff]  ;;  %s194_s9 = scalar_lea.hbm %s268_s2, 16 }
  0x27   :  { %v68_v2 = vmul.f32 0.5, %v66_v0  ;;  %v69_v3 = vmul.f32 0.5, %v67_v1  ;;  %v76_v8 = vld [vmem:[#allocation6] sm:$0xff]  ;;  %v77_v10 = vld [vmem:[#allocation6 + $0x8] sm:$0xff]  ;;  %p195_p2 = scmp.ne.s32.totalorder %s268_s2, %s194_s9  ;;  %p198_p3 = scmp.lt.u32.totalorder %s194_s9, %s268_s2 }
  0x29   :  { %146 = vtanh.f32 %v68_v2  ;;  %p200_p4 = pnand %p198_p3, %p195_p2 }
  0x2a   :  { %148 = vtanh.f32 %v69_v3 }
  0x33   :  { %v147_v4 = vpop.eup %146 }
  0x34   :  { %v149_v5 = vpop.eup %148  ;;  %v72_v6 = vmul.f32 0.5, %v147_v4 }
  0x35   :  { %v73_v7 = vmul.f32 0.5, %v149_v5 }
  0x36   :  { %v74_v9 = vadd.f32 0.5, %v72_v6 }
  0x37   :  { %v75_v11 = vadd.f32 0.5, %v73_v7 }
  0x38   :  { %v78_v12 = vmul.f32 %v76_v8, %v74_v9  ;;  %v80_v14 = vadd.f32 %v76_v8, %v74_v9 }
  0x39   :  { %v79_v13 = vmul.f32 %v77_v10, %v75_v11  ;;  %v81_v15 = vadd.f32 %v77_v10, %v75_v11 }
  0x3b   :  { %v83_v16 = vadd.f32 %v79_v13, %v78_v12  ;;  %v88_v17 = vadd.f32 %v81_v15, %v80_v14 }
  0x3d   :  { %95 = vadd.xlane.f32.xlu0 %v83_v16 }
  0x41   :  { %107 = vadd.xlane.f32.xlu0 %v88_v17 }
  0xca   :  { %v96_v18 = vpop.xlane.xlu0 %95 }
  0xcb   :  { %v97_v19 = vrot.slane %v96_v18, 4 }
  0xcd   :  { %v98_v20 = vadd.f32 %v97_v19, %v96_v18 }
  0xce   :  { %v108_v21 = vpop.xlane.xlu0 %107 }
  0xcf   :  { %v99_v22 = vrot.slane %v98_v20, 2  ;;  %v109_v23 = vrot.slane %v108_v21, 4 }
  0xd1   :  { %v110_v24 = vadd.f32 %v109_v23, %v108_v21  ;;  %v100_v25 = vadd.f32 %v99_v22, %v98_v20 }
  0xd3   :  { %v111_v26 = vrot.slane %v110_v24, 2  ;;  %v101_v27 = vrot.slane %v100_v25, 1 }
  0xd5   :  { %v112_v28 = vadd.f32 %v111_v26, %v110_v24  ;;  %v102_v29 = vadd.f32 %v101_v27, %v100_v25 }
  0xd7   :  { %137 = vpush %v102_v29  ;;  %v113_v30 = vrot.slane %v112_v28, 1 }
  0xd9   :  { %v114_v31 = vadd.f32 %v113_v30, %v112_v28 }
  0xdb   :  { %139 = vpush %v114_v31 }
 0x108   :  { %s138_s1 = spop %137 }
 0x109   :  { %105 = sst [smem:[#allocation8]] %s138_s1 }
 0x10c   :  { %s140_s6 = spop %139 }
 0x10d   :  { %117 = sst [smem:[#allocation8 + $0x1]] %s140_s6 }
 0x10e   :  { %203 = shalt.err (!%p200_p4)
}
 0x10f   :  { %s214_s14 = smov [#allocation8]  }
 0x110   :  { %125 = dma.smem_to_hbm %s214_s14, 16, %s268_s2, [#allocation5]  }
 0x111   :  { %208 = dma.done.wait [#allocation5], 16  }
 0x112   :  { %209 = vsyncadd [#allocation5], 4294967280 }
 0x113   :  { %129 = sfence }
 0x114   :  { %130 = vsyncpa [#allocation4], 1 }
 0x115   :  { %131 = vsyncpa [#allocation7], 1 }
 0x116   :  { %132 = vsyncpa [#allocation5], 1 }

</bundles_post_ra>
